<compile_context>
chip_gen: v7x
topology: tpu7x:2x2x1
jax: 0.10.0
libtpu: 0.0.40
codegen_flags: <defaults>
</compile_context>

<pallas_src>
import functools

import jax
import jax.numpy as jnp
from jax.experimental import pallas as pl
from jax.experimental.pallas import tpu as pltpu


def _round_up(x, m):
    return ((x + m - 1) // m) * m


def _vmem_capacity_bytes():
    try:
        return int(pltpu.get_tpu_info().vmem_capacity_bytes)
    except Exception:
        return 64 * 1024 * 1024      # conservative fallback (v7x per-core VMEM)


def _attn_working_set_bytes(bt, c, cqp, n, tq):
    """Approx. f32 bytes resident in VMEM for one attention-kernel grid step
    (double-buffered blocks + in-body temporaries)."""
    blocks = 2 * (bt * cqp * tq       # q tile
                  + bt * cqp * n      # k (full N)
                  + bt * c * n        # v (full N)
                  + bt * c * tq       # x residual tile
                  + bt * c * tq       # out tile
                  + bt * tq * n)      # attn rows
    temps = 3 * tq * n + 2 * c * tq   # energy / p / attn + out temporaries
    return 4 * (blocks + temps)


def _pick_tiling(b, c, cqp, n, vmem_cap):
    """Choose (Bt, TQ): lane-dense query tile, biggest that fits the VMEM budget."""
    budget = int(0.55 * vmem_cap)
    # TQ=512 only on 128 MiB parts (v5e/v6e); 256 ceiling on 64 MiB (v7x).
    max_tq = 512 if vmem_cap >= 100 * 1024 * 1024 else 256
    tqs = [t for t in (512, 256, 128) if t <= max_tq and n % t == 0]
    if not tqs:
        tqs = [n]                     # tiny / odd N: one full-row tile
    # Pack several images per step only in the tiny-N regime (amortize ~0.35us
    # per-grid-step overhead); at large N the grid axis handles batching.
    bts = [d for d in range(min(b, 8), 0, -1) if b % d == 0] if n <= 512 else [1]
    for tq in tqs:
        for bt in bts:
            if _attn_working_set_bytes(bt, c, cqp, n, tq) <= budget:
                return bt, tq
    return 1, tqs[-1]


def _qkv_proj_kernel(x_ref, w_ref, b_ref, q_ref, k_ref, v_ref, *, bt, cqp, c):
    """q/k/v = W_{q,k,v} @ x + b for a (Bt, C, TQ) tile of x.

    Kept in f32 (tiny flop count; exactness of the padded-row trick preserved).
    Padded rows of Wq/Wk and their biases are zero, so the extra q/k channels
    are exactly zero and contribute nothing to the energy.
    """
    w = w_ref[...]                    # (M, C), M = 2*cqp + c
    bias = b_ref[...]                 # (M, 1)

    def body(bb, carry):
        qkv = jnp.dot(w, x_ref[bb], preferred_element_type=jnp.float32) + bias
        q_ref[bb] = qkv[0:cqp, :]
        k_ref[bb] = qkv[cqp:2 * cqp, :]
        v_ref[bb] = qkv[2 * cqp:2 * cqp + c, :]
        return carry

    jax.lax.fori_loop(0, bt, body, 0)


def _attn_kernel(q_ref, k_ref, v_ref, x_ref, gamma_ref, out_ref, attn_ref, *,
                 bt, mxu_dtype):
    """One (Bt, TQ) slab of attention rows + the matching (C, TQ) output tile."""
    gamma = gamma_ref[0]              # scalar, read once from SMEM

    def body(bb, carry):
        q = q_ref[bb].astype(mxu_dtype)                         # (cqp, tq)
        k = k_ref[bb].astype(mxu_dtype)                         # (cqp, n)
        # energy[i, j] = <q_i, k_j> : contract the channel axis, no transposes.
        energy = jax.lax.dot_general(
            q, k, dimension_numbers=(((0,), (0,)), ((), ())),
            preferred_element_type=jnp.float32)                 # (tq, n) f32
        # Softmax stays in f32 (VPU/EUP); reciprocal+mul instead of a wide divide.
        e_max = jnp.max(energy, axis=-1, keepdims=True)
        p = jnp.exp(energy - e_max)
        denom = jnp.sum(p, axis=-1, keepdims=True)
        attn = p * pl.reciprocal(denom, approx=False)           # (tq, n)
        # out[:, i] = sum_j attn[i, j] * v[:, j]   (== torch.bmm(V, attn^T))
        out = jax.lax.dot_general(
            v_ref[bb].astype(mxu_dtype), attn.astype(mxu_dtype),
            dimension_numbers=(((1,), (1,)), ((), ())),
            preferred_element_type=jnp.float32)                 # (c, tq)
        out_ref[bb] = (gamma * out + x_ref[bb]).astype(out_ref.dtype)
        attn_ref[bb] = attn.astype(attn_ref.dtype)
        return carry

    jax.lax.fori_loop(0, bt, body, 0)


def self_attn_forward(x, wq, bq, wk, bk, wv, bv, gamma, *,
                      mxu_dtype=jnp.bfloat16, attn_dtype=jnp.float32):
    """x: (B, C, W, H) float32. Returns (out (B, C, W, H), attention (B, N, N))."""
    B, C, W, H = x.shape
    N = W * H
    Cq = wq.shape[0]
    Cqp = max(8, _round_up(Cq, 8))    # sublane-aligned q/k channel count
    M = 2 * Cqp + C

    vmem_cap = _vmem_capacity_bytes()
    Bt, TQ = _pick_tiling(B, C, Cqp, N, vmem_cap)
    nb, nq = B // Bt, N // TQ

    est = _attn_working_set_bytes(Bt, C, Cqp, N, TQ)
    vmem_limit = int(min(max(1.25 * est, 32 * 1024 * 1024), 0.85 * vmem_cap))

    # (C, N) layout — pure reshape, no wrapper transposes.
    x_cn = x.reshape(B, C, N)

    # Fused, zero-padded QKV weights / biases (padded rows are zero -> exact).
    pad_q = Cqp - Cq
    w_fused = jnp.concatenate([
        jnp.pad(wq, ((0, pad_q), (0, 0))),
        jnp.pad(wk, ((0, pad_q), (0, 0))),
        wv,
    ], axis=0)                                   # (M, C)
    b_fused = jnp.concatenate([
        jnp.pad(bq, (0, pad_q)),
        jnp.pad(bk, (0, pad_q)),
        bv,
    ]).reshape(M, 1)                             # (M, 1)
    gamma1 = jnp.asarray(gamma, dtype=jnp.float32).reshape(1)

    # --- Kernel 1: fused QKV projection, tiled over (batch, N). ---
    # Note: w/b have constant index maps so Pallas only DMAs them once.
    q_all, k_all, v_all = pl.pallas_call(
        functools.partial(_qkv_proj_kernel, bt=Bt, cqp=Cqp, c=C),
        out_shape=(
            jax.ShapeDtypeStruct((B, Cqp, N), jnp.float32),
            jax.ShapeDtypeStruct((B, Cqp, N), jnp.float32),
            jax.ShapeDtypeStruct((B, C, N), jnp.float32),
        ),
        grid_spec=pltpu.PrefetchScalarGridSpec(
            num_scalar_prefetch=0,
            grid=(nb, nq),
            in_specs=[
                pl.BlockSpec((Bt, C, TQ), lambda b, q: (b, 0, q)),     # x tile
                pl.BlockSpec((M, C), lambda b, q: (0, 0)),             # W_qkv
                pl.BlockSpec((M, 1), lambda b, q: (0, 0)),             # bias
            ],
            out_specs=[
                pl.BlockSpec((Bt, Cqp, TQ), lambda b, q: (b, 0, q)),   # q
                pl.BlockSpec((Bt, Cqp, TQ), lambda b, q: (b, 0, q)),   # k
                pl.BlockSpec((Bt, C, TQ), lambda b, q: (b, 0, q)),     # v
            ],
        ),
        compiler_params=pltpu.CompilerParams(
            dimension_semantics=("parallel", "parallel"),
            vmem_limit_bytes=vmem_limit,
        ),
    )(x_cn, w_fused, b_fused)

    # --- Kernel 2: attention + residual, tiled over (batch, query tile). ---
    # No carried state across grid steps, so both axes are "parallel" (megacore).
    out_cn, attn = pl.pallas_call(
        functools.partial(_attn_kernel, bt=Bt, mxu_dtype=mxu_dtype),
        out_shape=(
            jax.ShapeDtypeStruct((B, C, N), x.dtype),
            jax.ShapeDtypeStruct((B, N, N), attn_dtype),
        ),
        grid_spec=pltpu.PrefetchScalarGridSpec(
            num_scalar_prefetch=0,
            grid=(nb, nq),
            in_specs=[
                pl.BlockSpec((Bt, Cqp, TQ), lambda b, q: (b, 0, q)),   # q tile
                pl.BlockSpec((Bt, Cqp, N), lambda b, q: (b, 0, 0)),    # k (full N)
                pl.BlockSpec((Bt, C, N), lambda b, q: (b, 0, 0)),      # v (full N)
                pl.BlockSpec((Bt, C, TQ), lambda b, q: (b, 0, q)),     # x residual
                pl.BlockSpec(memory_space=pltpu.MemorySpace.SMEM),     # gamma (1,)
            ],
            out_specs=[
                pl.BlockSpec((Bt, C, TQ), lambda b, q: (b, 0, q)),     # out tile
                pl.BlockSpec((Bt, TQ, N), lambda b, q: (b, q, 0)),     # attn rows
            ],
        ),
        compiler_params=pltpu.CompilerParams(
            dimension_semantics=("parallel", "parallel"),
            vmem_limit_bytes=vmem_limit,
        ),
    )(q_all, k_all, v_all, x_cn, gamma1)

    return out_cn.reshape(B, C, W, H), attn


def self_attn_reference(x, wq, bq, wk, bk, wv, bv, gamma):
    """Pure-JAX reference mirroring the PyTorch forward (all f32)."""
    B, C, W, H = x.shape
    N = W * H
    x_cn = x.reshape(B, C, N)
    q = jnp.einsum('qc,bcn->bqn', wq, x_cn) + bq[None, :, None]
    k = jnp.einsum('qc,bcn->bqn', wk, x_cn) + bk[None, :, None]
    v = jnp.einsum('oc,bcn->bon', wv, x_cn) + bv[None, :, None]
    energy = jnp.einsum('bqn,bqm->bnm', q, k)                     # (B, N, N)
    attn = jax.nn.softmax(energy, axis=-1)
    out = jnp.einsum('bcm,bnm->bcn', v, attn)                     # (B, C, N)
    out = gamma.reshape(()) * out + x_cn
    return out.reshape(B, C, W, H), attn


if __name__ == "__main__":
    # in_dim must be divisible by 8 (query/key project to in_dim // 8 channels).
    B, C, W, H = 2, 32, 8, 8
    Cq = C // 8

    key = jax.random.PRNGKey(0)
    kx, kq, kk, kv, kbq, kbk, kbv = jax.random.split(key, 7)

    x = jax.random.normal(kx, (B, C, W, H), dtype=jnp.float32)

    # Conv2d(kernel_size=1) weights: (out_ch, in_ch, 1, 1) stored as (out_ch, in_ch).
    wq = 0.1 * jax.random.normal(kq, (Cq, C), dtype=jnp.float32)
    wk = 0.1 * jax.random.normal(kk, (Cq, C), dtype=jnp.float32)
    wv = 0.1 * jax.random.normal(kv, (C, C), dtype=jnp.float32)
    bq = 0.01 * jax.random.normal(kbq, (Cq,), dtype=jnp.float32)
    bk = 0.01 * jax.random.normal(kbk, (Cq,), dtype=jnp.float32)
    bv = 0.01 * jax.random.normal(kbv, (C,), dtype=jnp.float32)
    # The module initializes gamma to 0; use a nonzero value so the attention
    # path inside `out` is actually exercised by the numeric check.
    gamma = jnp.full((1,), 0.7, dtype=jnp.float32)

    out, attn = self_attn_forward(x, wq, bq, wk, bk, wv, bv, gamma)
    out = jax.block_until_ready(out)
    attn = jax.block_until_ready(attn)

    out_ref, attn_ref = self_attn_reference(x, wq, bq, wk, bk, wv, bv, gamma)
    assert out.shape == (B, C, W, H) and attn.shape == (B, W * H, W * H)
    # Tolerances account for bf16 MXU operands (f32 accumulation, f32 softmax).
    assert jnp.allclose(attn, attn_ref, atol=2e-3, rtol=2e-2), \
        float(jnp.max(jnp.abs(attn - attn_ref)))
    assert jnp.allclose(out, out_ref, atol=1e-2, rtol=1e-2), \
        float(jnp.max(jnp.abs(out - out_ref)))

    print("KERNEL_OK")
</pallas_src>

<mosaic_0001>
module attributes {stable_mosaic.version = 11 : i64} {
  func.func @_qkv_proj_kernel(%arg0: i32, %arg1: i32, %arg2: memref<2x32x64xf32, #tpu.memory_space<vmem>>, %arg3: memref<48x32xf32, #tpu.memory_space<vmem>>, %arg4: memref<48x1xf32, #tpu.memory_space<vmem>>, %arg5: memref<2x8x64xf32, #tpu.memory_space<vmem>>, %arg6: memref<2x8x64xf32, #tpu.memory_space<vmem>>, %arg7: memref<2x32x64xf32, #tpu.memory_space<vmem>>) attributes {dimension_semantics = [#tpu.dimension_semantics<parallel>, #tpu.dimension_semantics<parallel>], iteration_bounds = array<i64: 1, 1>, scalar_prefetch = 0 : i64, scratch_operands = 0 : i64, tpu.core_type = #tpu.core_type<tc>, window_params = [{transform_indices = @transform_0, window_bounds = array<i64: 2, 32, 64>}, {pipeline_mode = #tpu.pipeline_mode<synchronous>, transform_indices = @transform_1, window_bounds = array<i64: 48, 32>}, {pipeline_mode = #tpu.pipeline_mode<synchronous>, transform_indices = @transform_2, window_bounds = array<i64: 48, 1>}, {transform_indices = @transform_3, window_bounds = array<i64: 2, 8, 64>}, {transform_indices = @transform_4, window_bounds = array<i64: 2, 8, 64>}, {transform_indices = @transform_5, window_bounds = array<i64: 2, 32, 64>}]} {
    %c0 = arith.constant 0 : index
    %c0_0 = arith.constant 0 : index
    %0 = vector.load %arg3[%c0, %c0_0] : memref<48x32xf32, #tpu.memory_space<vmem>>, vector<48x32xf32>
    %c0_1 = arith.constant 0 : index
    %c0_2 = arith.constant 0 : index
    %1 = vector.load %arg4[%c0_1, %c0_2] : memref<48x1xf32, #tpu.memory_space<vmem>>, vector<48x1xf32>
    %c0_i32 = arith.constant 0 : i32
    %c2_i32 = arith.constant 2 : i32
    %2 = arith.addi %c0_i32, %c2_i32 : i32
    %c1_i32 = arith.constant 1 : i32
    scf.for %arg8 = %c0_i32 to %2 step %c1_i32  : i32 {
      %3 = arith.index_cast %arg8 : i32 to index
      %c0_4 = arith.constant 0 : index
      %c0_5 = arith.constant 0 : index
      %4 = vector.load %arg2[%3, %c0_4, %c0_5] : memref<2x32x64xf32, #tpu.memory_space<vmem>>, vector<1x32x64xf32>
      %5 = vector.shape_cast %4 : vector<1x32x64xf32> to vector<32x64xf32>
      %cst = arith.constant dense<0.000000e+00> : vector<48x64xf32>
      %6 = tpu.matmul %0, %5, %cst {dimension_numbers = #tpu.dot_dimension_numbers<[1], [0], [0], [1], [0, 0, 1, 1], [], []>} : vector<48x32xf32>, vector<32x64xf32>, vector<48x64xf32> -> vector<48x64xf32>
      %7 = vector.broadcast %1 : vector<48x1xf32> to vector<48x64xf32>
      %8 = arith.addf %6, %7 : vector<48x64xf32>
      %9 = vector.extract_strided_slice %8 {offsets = [0, 0], sizes = [8, 64], strides = [1, 1]} : vector<48x64xf32> to vector<8x64xf32>
      %10 = arith.index_cast %arg8 : i32 to index
      %c0_6 = arith.constant 0 : index
      %c0_7 = arith.constant 0 : index
      %11 = vector.load %arg5[%10, %c0_6, %c0_7] : memref<2x8x64xf32, #tpu.memory_space<vmem>>, vector<1x8x64xf32>
      %12 = vector.shape_cast %11 : vector<1x8x64xf32> to vector<8x64xf32>
      %13 = vector.shape_cast %9 : vector<8x64xf32> to vector<1x8x64xf32>
      tpu.vector_store %arg5[%10, %c0_6, %c0_7], %13 {strides = array<i32>} : memref<2x8x64xf32, #tpu.memory_space<vmem>>, vector<1x8x64xf32>,
      %14 = vector.extract_strided_slice %8 {offsets = [8, 0], sizes = [8, 64], strides = [1, 1]} : vector<48x64xf32> to vector<8x64xf32>
      %15 = arith.index_cast %arg8 : i32 to index
      %c0_8 = arith.constant 0 : index
      %c0_9 = arith.constant 0 : index
      %16 = vector.load %arg6[%15, %c0_8, %c0_9] : memref<2x8x64xf32, #tpu.memory_space<vmem>>, vector<1x8x64xf32>
      %17 = vector.shape_cast %16 : vector<1x8x64xf32> to vector<8x64xf32>
      %18 = vector.shape_cast %14 : vector<8x64xf32> to vector<1x8x64xf32>
      tpu.vector_store %arg6[%15, %c0_8, %c0_9], %18 {strides = array<i32>} : memref<2x8x64xf32, #tpu.memory_space<vmem>>, vector<1x8x64xf32>,
      %19 = vector.extract_strided_slice %8 {offsets = [16, 0], sizes = [32, 64], strides = [1, 1]} : vector<48x64xf32> to vector<32x64xf32>
      %20 = arith.index_cast %arg8 : i32 to index
      %c0_10 = arith.constant 0 : index
      %c0_11 = arith.constant 0 : index
      %21 = vector.load %arg7[%20, %c0_10, %c0_11] : memref<2x32x64xf32, #tpu.memory_space<vmem>>, vector<1x32x64xf32>
      %22 = vector.shape_cast %21 : vector<1x32x64xf32> to vector<32x64xf32>
      %23 = vector.shape_cast %19 : vector<32x64xf32> to vector<1x32x64xf32>
      tpu.vector_store %arg7[%20, %c0_10, %c0_11], %23 {strides = array<i32>} : memref<2x32x64xf32, #tpu.memory_space<vmem>>, vector<1x32x64xf32>,
    }
    %c2_i32_3 = arith.constant 2 : i32
    return
  }
  func.func @transform_0(%arg0: i32, %arg1: i32) -> (i32, i32, i32) {
    %c0_i32 = arith.constant 0 : i32
    %c0_i32_0 = arith.constant 0 : i32
    return %arg0, %c0_i32, %arg1 : i32, i32, i32
  }
  func.func @transform_1(%arg0: i32, %arg1: i32) -> (i32, i32) {
    %c0_i32 = arith.constant 0 : i32
    %c0_i32_0 = arith.constant 0 : i32
    %c0_i32_1 = arith.constant 0 : i32
    return %c0_i32, %c0_i32_0 : i32, i32
  }
  func.func @transform_2(%arg0: i32, %arg1: i32) -> (i32, i32) {
    %c0_i32 = arith.constant 0 : i32
    %c0_i32_0 = arith.constant 0 : i32
    %c0_i32_1 = arith.constant 0 : i32
    return %c0_i32, %c0_i32_0 : i32, i32
  }
  func.func @transform_3(%arg0: i32, %arg1: i32) -> (i32, i32, i32) {
    %c0_i32 = arith.constant 0 : i32
    %c0_i32_0 = arith.constant 0 : i32
    return %arg0, %c0_i32, %arg1 : i32, i32, i32
  }
  func.func @transform_4(%arg0: i32, %arg1: i32) -> (i32, i32, i32) {
    %c0_i32 = arith.constant 0 : i32
    %c0_i32_0 = arith.constant 0 : i32
    return %arg0, %c0_i32, %arg1 : i32, i32, i32
  }
  func.func @transform_5(%arg0: i32, %arg1: i32) -> (i32, i32, i32) {
    %c0_i32 = arith.constant 0 : i32
    %c0_i32_0 = arith.constant 0 : i32
    return %arg0, %c0_i32, %arg1 : i32, i32, i32
  }
}

</mosaic_0001>

<bundles_post_ra>
// kernel: tpu_custom_call.1
= control target key start
LH: loop header
LB: loop body
LE: loop exit
PB: predicated region body
PF: predicated region fallthrough
CT: control target
= control target key end

     0   :  { %11 = vsyncpa [#allocation3], 0  ;;  %s588_s0 = inlined_call_operand.vmem [shape: f32[2,32,64], index: 0, kind: input, shape index: {}]   ;;  %s589_s1 = inlined_call_operand.vmem [shape: f32[48,32], index: 1, kind: input, shape index: {}]   ;;  %s590_s2 = inlined_call_operand.vmem [shape: f32[48,1], index: 2, kind: input, shape index: {}]   ;;  %s591_s3 = inlined_call_operand.hbm [shape: f32[2,8,64], index: 3, kind: output, shape index: {0}]   ;;  %s592_s4 = inlined_call_operand.hbm [shape: f32[2,8,64], index: 4, kind: output, shape index: {1}]   ;;  %s593_s5 = inlined_call_operand.hbm [shape: f32[2,32,64], index: 5, kind: output, shape index: {2}]  }
   0x1   :  { %12 = vsyncpa [#allocation5], 0  ;;  %v438_v0 = vld [vmem:[%s589_s1] sm:$0xff]  ;;  %v443_v1 = vld [vmem:[%s589_s1 + $0x8] sm:$0xff]  ;;  %s495_s16 = smov 0  }
   0x2   :  { %v448_v2 = vld [vmem:[%s589_s1 + $0x10] sm:$0xff]  ;;  %v453_v3 = vld [vmem:[%s589_s1 + $0x18] sm:$0xff]  ;;  %v458_v4 = vld [vmem:[%s589_s1 + $0x20] sm:$0xff] }
   0x3   :  { %v463_v5 = vld [vmem:[%s589_s1 + $0x28] sm:$0xff]  ;;  %v468_v6 = vld [vmem:[%s590_s2] sm:$0xff]  ;;  %v478_v8 = vld [vmem:[%s590_s2 + $0x10] sm:$0xff] }
   0x4   :  { %v473_v7 = vld [vmem:[%s590_s2 + $0x8] sm:$0xff]  ;;  %v483_v9 = vld [vmem:[%s590_s2 + $0x18] sm:$0xff]  ;;  %v488_v10 = vld [vmem:[%s590_s2 + $0x20] sm:$0xff] }
   0x5   :  { %v493_v11 = vld [vmem:[%s590_s2 + $0x28] sm:$0xff] }
   0x6 LB: > { %vm73_vm0 = vcmask 261120   ;;  %s258_s17 = sshll.u32 %s397_s16, 5  ;;  %v399_v12 = vmov 0   ;;  %s265_s20 = sshll.u32 %s397_s16, 3  ;;  %vm189_vm1 = vcmask 523264   ;;  %s397_s16 = sphi %s495_s16, %s36_s16  }
   0x7   : > { %284 = vmatprep.mubr.msk.f32.mxu0 %vm73_vm0, %v438_v0  ;;  %287 = vmatprep.mubr.msk.f32.mxu1 %vm73_vm0, %v448_v2  ;;  %s38_s19 = scalar_lea.vmem %s588_s0, %s258_s17  ;;  %s191_s21 = scalar_lea.vmem [#allocation4], %s265_s20 }
   0x8   : > { %320 = vset.pattern.permute.xlu1 %v399_v12  ;;  %319 = vset.pattern.permute.xlu0 %v399_v12  ;;  %v39_v13 = vld [vmem:[%s38_s19] sm:$0xff]  ;;  %v40_v14 = vld [vmem:[%s38_s19 + $0x8] sm:$0xff]  ;;  %v41_v15 = vld [vmem:[%s38_s19 + $0x10] sm:$0xff]  ;;  %s193_s22 = scalar_lea.vmem [#allocation6], %s258_s17  ;;  %s188_s23 = scalar_lea.vmem [#allocation2], %s265_s20 }
   0x9   : > { %55 = vperm.xlu1 %320, %v478_v8   ;;  %45 = vperm.xlu0 %319, %v468_v6   ;;  %v293_v16 = vpack.c.bf16 %v40_v14, %v39_v13  ;;  %v42_v17 = vld [vmem:[%s38_s19 + $0x18] sm:$0xff]  ;;  %s36_s16 = sadd.s32 1, %s397_s16  }
   0xa   : > { %v297_v18 = vpack.c.bf16 %v42_v17, %v41_v15  ;;  %p33_p0 = scmp.ge.s32.totalorder %s36_s16, 2  }
   0xb   : > { %294 = vmatprep.subr.bf16.mxu0 %v293_v16  ;;  %301 = vmatprep.subr.bf16.mxu1 %v293_v16  ;;  %s400_s24 = smov (%p33_p0), [#allocation4]   ;;  %s401_s26 = smov (%p33_p0), [#allocation2]  }
   0xc   : > { %296 = vmatpush3.bf16.msra.mxu0 %v293_v16  ;;  %303 = vmatpush3.bf16.msra.mxu1 %v293_v16  ;;  %s215_s25 = sshll.u32 (%p33_p0), %s400_s24, 4  ;;  %s203_s27 = sshll.u32 (%p33_p0), %s401_s26, 4  ;;  %s216_s25 = int_to_ptr.vmem [resolvable:$true] %s215_s25  ;;  %s536_s27 = int_to_ptr.vmem [resolvable:$true] %s203_s27 }
   0xd   : > { %298 = vmatprep.subr.bf16.mxu0 %v297_v18  ;;  %302 = vmatprep.subr.bf16.mxu1 %v297_v18  ;;  %s321_s28 = scalar_lea.vmem (%p33_p0), %s216_s25, 256  ;;  %p326_p2 = scmp.lt.s32.totalorder (%p33_p0), %s216_s25, %s216_s25 }
   0xe   : > { %60 = vperm.xlu1 %320, %v483_v9   ;;  %50 = vperm.xlu0 %319, %v473_v7   ;;  %p322_p1 = scmp.ne.s32.totalorder (%p33_p0), %s216_s25, %s321_s28  ;;  %p327_p3 = scmp.lt.s32.totalorder (%p33_p0), %s321_s28, %s321_s28 }
  0x10   : > { %300 = vmatpush3.bf16.msra.mxu0 %v297_v18  ;;  %304 = vmatpush3.bf16.msra.mxu1 %v297_v18  ;;  %p328_p4 = por (%p33_p0), %p327_p3, %p326_p2 }
  0x12   : > { %70 = vperm.xlu1 %320, %v493_v11   ;;  %65 = vperm.xlu0 %319, %v488_v10   ;;  %p329_p5 = pnand (%p33_p0), %p328_p4, %p322_p1 }
  0x13   : > { %285 = vmatmul.mubr.msk.f32.vlgmr.msra.gmra.mrb[0].mxu0 %vm73_vm0, %v443_v1  ;;  %288 = vmatmul.mubr.msk.f32.vlgmr.msra.gmra.mrb[0].mxu1 %vm73_vm0, %v453_v3 }
  0x14   : > { %290 = vmatprep.mubr.msk.f32.mxu1 %vm73_vm0, %v458_v4 }
  0x17   : > { %291 = vmatmul.mubr.msk.f32.gmra.mrb[2].mxu1 %vm73_vm0, %v463_v5 }
  0x88   : > { %v56_v19 = vpop.permute.xlu1 %55  ;;  %v46_v20 = vpop.permute.xlu0 %45 }
  0x8d   : > { %v61_v21 = vpop.permute.xlu1 %60  ;;  %v51_v22 = vpop.permute.xlu0 %50 }
  0x91   : > { %v71_v31 = vpop.permute.xlu1 %70  ;;  %v66_v33 = vpop.permute.xlu0 %65 }
  0xe6   : > { %v286_v23 = vpop.f32.mrb[0].mxu0  ;;  %v289_v24 = vpop.f32.mrb[0].mxu1 }
  0xe7   : > { %v164_v25 = vadd.f32 %v286_v23, %v51_v22  ;;  %v174_v26 = vadd.f32 %v289_v24, %v61_v21  ;;  %v158_v27 = vpop.f32.mrb[1].mxu0  ;;  %v168_v28 = vpop.f32.mrb[1].mxu1 }
  0xe8   : > { %v159_v29 = vadd.f32 %v158_v27, %v46_v20  ;;  %v169_v30 = vadd.f32 %v168_v28, %v56_v19  ;;  %35 = sbr.rel (!%p33_p0) target bundleno = 6 (0x6), region = 59 }
  0xe9   : > { %192 = vst.msk [vmem:[%s191_s21] sm:$0xff] %vm189_vm1, %v164_v25  ;;  %195 = vst.msk [vmem:[%s193_s22 + $0x8] sm:$0xff] %vm189_vm1, %v174_v26 }
  0xea   : > { %190 = vst.msk [vmem:[%s188_s23] sm:$0xff] %vm189_vm1, %v159_v29  ;;  %194 = vst.msk [vmem:[%s193_s22] sm:$0xff] %vm189_vm1, %v169_v30  ;;  %v292_v32 = vpop.f32.mrb[2].mxu1 }
  0xeb   : > { %v184_v34 = vadd.f32 %v292_v32, %v71_v31  ;;  %v178_v35 = vpop.f32.mrb[3].mxu1 }
  0xec   : > { %v179_v36 = vadd.f32 %v178_v35, %v66_v33 }
  0xed   : > { %197 = vst.msk [vmem:[%s193_s22 + $0x18] sm:$0xff] %vm189_vm1, %v184_v34 }
  0xee   : > { %196 = vst.msk [vmem:[%s193_s22 + $0x10] sm:$0xff] %vm189_vm1, %v179_v36 }
  0xef   :  { %332 = shalt.err (!%p329_p5)
}
  0xf0   :  { %s333_s6 = scalar_lea.hbm %s592_s4, 256 }
  0xf1   :  { %p334_p6 = scmp.ne.s32.totalorder %s592_s4, %s333_s6  ;;  %p337_p7 = scmp.lt.u32.totalorder %s333_s6, %s592_s4 }
  0xf3   :  { %p339_p8 = pnand %p337_p7, %p334_p6 }
  0xf5   :  { %342 = shalt.err (!%p339_p8)
}
  0xf6   :  { %s402_s10 = smov 128   ;;  %s403_s11 = smov 8  }
  0xf7   :  { %221 = dma.vmem_to_hbm [thread:$0]  %s216_s25, 256, %s592_s4, [#allocation5], %s402_s10, %s402_s10, %s403_s11  }
  0xf8   :  { %s343_s13 = scalar_lea.vmem %s536_s27, 256  ;;  %p348_p10 = scmp.lt.s32.totalorder %s536_s27, %s536_s27 }
  0xf9   :  { %p344_p9 = scmp.ne.s32.totalorder %s536_s27, %s343_s13  ;;  %p349_p11 = scmp.lt.s32.totalorder %s343_s13, %s343_s13 }
  0xfb   :  { %p350_p12 = por %p349_p11, %p348_p10 }
  0xfd   :  { %p351_p13 = pnand %p350_p12, %p344_p9 }
  0xff   :  { %354 = shalt.err (!%p351_p13)
}
 0x100   :  { %s355_s16 = scalar_lea.hbm %s591_s3, 256 }
 0x101   :  { %p356_p0 = scmp.ne.s32.totalorder %s591_s3, %s355_s16  ;;  %p359_p1 = scmp.lt.u32.totalorder %s355_s16, %s591_s3 }
 0x103   :  { %p361_p2 = pnand %p359_p1, %p356_p0 }
 0x105   :  { %364 = shalt.err (!%p361_p2)
}
 0x106   :  { %209 = dma.vmem_to_hbm [thread:$0]  %s536_s27, 256, %s591_s3, [#allocation3], %s402_s10, %s402_s10, %s403_s11  }
 0x107   :  { %s404_s21 = smov [#allocation6]  }
 0x108   :  { %s227_s22 = sshll.u32 %s404_s21, 4  ;;  %s228_s22 = int_to_ptr.vmem [resolvable:$true] %s227_s22 }
 0x109   :  { %s365_s23 = scalar_lea.vmem %s228_s22, 1024  ;;  %p370_p4 = scmp.lt.s32.totalorder %s228_s22, %s228_s22 }
 0x10a   :  { %p366_p3 = scmp.ne.s32.totalorder %s228_s22, %s365_s23  ;;  %p371_p5 = scmp.lt.s32.totalorder %s365_s23, %s365_s23 }
 0x10c   :  { %p372_p6 = por %p371_p5, %p370_p4 }
 0x10e   :  { %p373_p7 = pnand %p372_p6, %p366_p3 }
 0x110   :  { %376 = shalt.err (!%p373_p7)
}
 0x111   :  { %s377_s26 = scalar_lea.hbm %s593_s5, 1024 }
 0x112   :  { %p378_p8 = scmp.ne.s32.totalorder %s593_s5, %s377_s26  ;;  %p381_p9 = scmp.lt.u32.totalorder %s377_s26, %s593_s5 }
 0x114   :  { %p383_p10 = pnand %p381_p9, %p378_p8 }
 0x116   :  { %386 = shalt.err (!%p383_p10)
}
 0x117   :  { %233 = dma.vmem_to_hbm [thread:$0]  %s228_s22, 1024, %s593_s5, [#allocation5], %s402_s10, %s402_s10, %s403_s11  }
 0x118   :  { %391 = dma.done.wait [#allocation3], 256  }
 0x119   :  { %392 = vsyncadd [#allocation3], 4294967040 }
 0x11a   :  { %393 = dma.done.wait [#allocation5], 1280  }
 0x11b   :  { %394 = vsyncadd [#allocation5], 4294966016 }
 0x11c   :  { %243 = vsyncpa [#allocation3], 1 }
 0x11d   :  { %244 = vsyncpa [#allocation5], 1 }

</bundles_post_ra>
